<compile_context>
chip_gen: v7x
topology: tpu7x:2x2x1
jax: 0.10.0
libtpu: 0.0.40
codegen_flags: <defaults>
</compile_context>

<pallas_src>
import functools
import math

import jax
import jax.numpy as jnp
from jax.experimental import pallas as pl
from jax.experimental.pallas import tpu as pltpu


MATMUL_DTYPE = jnp.float32  # set to jnp.bfloat16 on v6e/v7x for MXU throughput


# ----------------------------- in-kernel helpers ---------------------------- #

def _erf_poly(x):
    """Abramowitz & Stegun 7.1.26 erf approximation (|err| < 1.5e-7).

    Uses only exp / mul / add / div / where, all of which have guaranteed
    Mosaic lowerings (avoids depending on an erf primitive inside the kernel).
    """
    a1, a2, a3, a4, a5 = (0.254829592, -0.284496736, 1.421413741,
                          -1.453152027, 1.061405429)
    p = 0.3275911
    ax = jnp.abs(x)
    t = 1.0 / (1.0 + p * ax)
    poly = ((((a5 * t + a4) * t + a3) * t + a2) * t + a1) * t
    y = 1.0 - poly * jnp.exp(-ax * ax)
    return jnp.where(x < 0.0, -y, y)


def _gelu_exact(x):
    # Matches torch nn.GELU() (exact erf formulation) to ~1e-7.
    return x * 0.5 * (1.0 + _erf_poly(x * (1.0 / math.sqrt(2.0))))


# ----------------------------- Pallas kernels ------------------------------ #

def _linear_kernel(*refs, nk, activation, fuse_ln, fuse_res, ln_eps):
    """Tiled (x [@ LN]) @ w + b [+ GELU] [+ residual] with K-axis accumulation."""
    idx = 0
    x_ref = refs[idx]; idx += 1
    w_ref = refs[idx]; idx += 1
    b_ref = refs[idx]; idx += 1
    if fuse_ln:
        g_ref = refs[idx]; idx += 1
        lb_ref = refs[idx]; idx += 1
    if fuse_res:
        r_ref = refs[idx]; idx += 1
    o_ref = refs[idx]; idx += 1
    acc_ref = refs[idx]

    k = pl.program_id(2)

    x = x_ref[...]
    if fuse_ln:
        # LayerNorm fused into the matmul input (requires tk == K, enforced by
        # the wrapper).  Recomputed per N-tile; still far cheaper than a
        # separate HBM round trip of the activation slab.
        mu = jnp.mean(x, axis=-1, keepdims=True)
        var = jnp.mean((x - mu) ** 2, axis=-1, keepdims=True)
        x = (x - mu) * jax.lax.rsqrt(var + ln_eps) * g_ref[...] + lb_ref[...]

    contrib = jnp.dot(x.astype(MATMUL_DTYPE), w_ref[...].astype(MATMUL_DTYPE),
                      preferred_element_type=jnp.float32)

    @pl.when(k == 0)
    def _():
        acc_ref[...] = contrib

    @pl.when(k > 0)
    def _():
        acc_ref[...] += contrib

    @pl.when(k == nk - 1)
    def _():
        out = acc_ref[...] + b_ref[...]
        if activation == "gelu":
            out = _gelu_exact(out)
        if fuse_res:
            out = out + r_ref[...]
        o_ref[...] = out.astype(o_ref.dtype)


def _attn_kernel(qkv_ref, o_ref, *, num_heads, scale):
    """All heads of one batch per grid step; single lane-dense (S, D) store."""
    qkv = qkv_ref[0]                       # (S, 3D) fp32, already in VMEM
    D = qkv.shape[-1] // 3
    dh = D // num_heads

    outs = []
    for h in range(num_heads):             # static unroll; one (S, S) score
        q = qkv[:, h * dh:(h + 1) * dh]    # block live at a time -> bounded VMEM
        k = qkv[:, D + h * dh:D + (h + 1) * dh]
        v = qkv[:, 2 * D + h * dh:2 * D + (h + 1) * dh]

        # q @ k^T without a materialized transpose (standard NT dim numbers).
        s = jax.lax.dot_general(
            q, k, (((1,), (1,)), ((), ())),
            preferred_element_type=jnp.float32) * scale
        s = s - jnp.max(s, axis=-1, keepdims=True)
        p = jnp.exp(s)
        # EUP approximate reciprocal -> frees the VALU divide slot.
        inv = pl.reciprocal(jnp.sum(p, axis=-1, keepdims=True), approx=True)
        outs.append(jnp.dot(p, v, preferred_element_type=jnp.float32) * inv)

    o_ref[0] = jnp.concatenate(outs, axis=-1)   # one lane-dense (S, D) store


# ------------------------------ Pallas wrappers ----------------------------- #

def _pick_tile(dim, desired):
    """Largest of `desired`/full-dim that evenly tiles `dim` (keeps the (8,128)
    rule satisfied: either a well-aligned desired tile or the full dimension)."""
    if dim <= desired:
        return dim
    if dim % desired == 0:
        return desired
    return dim


def pallas_linear(x, w, b, *, activation=None, ln=None, residual=None,
                  ln_eps=1e-5, tm=256, tn=256, tk=512):
    """y = [LN](x) @ w + b, optional exact GELU and fused residual add.

    Tile defaults are sized so 2 inputs x 2 pipeline buffers + accumulator fit
    comfortably under the scoped-VMEM limit on all generations (incl. v7x's
    64 MiB physical VMEM).
    """
    M, K = x.shape
    Kw, N = w.shape
    assert K == Kw
    fuse_ln = ln is not None
    fuse_res = residual is not None
    if fuse_ln:
        tk = K                      # LayerNorm needs the full feature dim per row

    tm = _pick_tile(M, tm)
    tn = _pick_tile(N, tn)
    tk = _pick_tile(K, tk)
    grid = (M // tm, N // tn, K // tk)
    nk = grid[2]

    in_specs = [
        pl.BlockSpec((tm, tk), lambda i, j, k: (i, k)),
        pl.BlockSpec((tk, tn), lambda i, j, k: (k, j)),
        pl.BlockSpec((1, tn), lambda i, j, k: (0, j)),
    ]
    args = [x, w, b.reshape(1, -1)]
    if fuse_ln:
        g, lb = ln
        in_specs += [pl.BlockSpec((1, tk), lambda i, j, k: (0, k)),
                     pl.BlockSpec((1, tk), lambda i, j, k: (0, k))]
        args += [g.reshape(1, -1), lb.reshape(1, -1)]
    if fuse_res:
        in_specs.append(pl.BlockSpec((tm, tn), lambda i, j, k: (i, j)))
        args.append(residual)

    kernel = functools.partial(_linear_kernel, nk=nk, activation=activation,
                               fuse_ln=fuse_ln, fuse_res=fuse_res, ln_eps=ln_eps)

    return pl.pallas_call(
        kernel,
        out_shape=jax.ShapeDtypeStruct((M, N), jnp.float32),
        grid=grid,
        in_specs=in_specs,
        out_specs=pl.BlockSpec((tm, tn), lambda i, j, k: (i, j)),
        scratch_shapes=[pltpu.VMEM((tm, tn), jnp.float32)],
        compiler_params=pltpu.CompilerParams(
            dimension_semantics=("parallel", "parallel", "arbitrary"),
            vmem_limit_bytes=48 * 1024 * 1024,  # safe on v5e/v6e/v7x
        ),
    )(*args)


def pallas_attention(qkv, num_heads, scale):
    """qkv: (B, S, 3D) fused projection output -> (B, S, D). Grid over batch."""
    B, S, threeD = qkv.shape
    D = threeD // 3
    return pl.pallas_call(
        functools.partial(_attn_kernel, num_heads=num_heads, scale=scale),
        out_shape=jax.ShapeDtypeStruct((B, S, D), jnp.float32),
        grid=(B,),
        in_specs=[pl.BlockSpec((1, S, threeD), lambda b: (b, 0, 0))],
        out_specs=pl.BlockSpec((1, S, D), lambda b: (b, 0, 0)),
        compiler_params=pltpu.CompilerParams(dimension_semantics=("parallel",)),
    )(qkv)


def make_pallas_ops():
    return dict(linear=pallas_linear, attention=pallas_attention)


# Pure-JAX reference ops (for correctness check only).
def make_ref_ops():
    def linear_ref(x, w, b, *, activation=None, ln=None, residual=None,
                   ln_eps=1e-5, **_):
        if ln is not None:
            g, lb = ln
            mu = x.mean(-1, keepdims=True)
            var = ((x - mu) ** 2).mean(-1, keepdims=True)
            x = (x - mu) * jax.lax.rsqrt(var + ln_eps) * g + lb
        h = x @ w + b
        if activation == "gelu":
            h = jax.nn.gelu(h, approximate=False)
        if residual is not None:
            h = h + residual
        return h

    def attention_ref(qkv, num_heads, scale):
        B, S, threeD = qkv.shape
        D = threeD // 3
        dh = D // num_heads
        q, k, v = jnp.split(qkv, 3, axis=-1)

        def heads(t):
            return t.reshape(B, S, num_heads, dh).transpose(0, 2, 1, 3)

        q, k, v = heads(q), heads(k), heads(v)
        s = jnp.einsum("bhqd,bhkd->bhqk", q, k) * scale
        p = jax.nn.softmax(s, axis=-1)
        o = jnp.einsum("bhqk,bhkd->bhqd", p, v)
        return o.transpose(0, 2, 1, 3).reshape(B, S, D)

    return dict(linear=linear_ref, attention=attention_ref)


# ------------------------------- Model forward ------------------------------ #

def image_to_patch(x, patch_size):
    # x: (B, C, H, W) -> (B, N, C*p*p)   (matches the torch image_to_patch)
    B, C, H, W = x.shape
    p = patch_size
    x = x.reshape(B, C, H // p, p, W // p, p)
    x = x.transpose(0, 2, 4, 1, 3, 5)
    return x.reshape(B, (H // p) * (W // p), C * p * p)


def transformer_block(x, lp, cfg, ops):
    # x: (B, S, D)  pre-LN block (LayerNorms / residuals fused into the matmuls).
    # The (B, S, D) internal layout is mathematically identical to the torch
    # (S, B, D) MultiheadAttention layout.
    B, S, D = x.shape
    nh = cfg["num_heads"]
    dh = D // nh
    xf = x.reshape(B * S, D)

    # --- multi-head self-attention:  LN1 fused into the QKV projection ---
    qkv = ops["linear"](xf, lp["attn_in_w"], lp["attn_in_b"],
                        ln=(lp["ln1_g"], lp["ln1_b"]))           # (B*S, 3D)
    attn = ops["attention"](qkv.reshape(B, S, 3 * D), nh,
                            1.0 / math.sqrt(dh))                 # (B, S, D)
    # output projection with the residual add fused in
    xf = ops["linear"](attn.reshape(B * S, D), lp["attn_out_w"],
                       lp["attn_out_b"], residual=xf)

    # --- MLP:  LN2 + GELU fused into the first matmul, residual into second ---
    h = ops["linear"](xf, lp["mlp_w1"], lp["mlp_b1"],
                      activation="gelu", ln=(lp["ln2_g"], lp["ln2_b"]))
    xf = ops["linear"](h, lp["mlp_w2"], lp["mlp_b2"], residual=xf)

    return xf.reshape(B, S, D)


def vit_forward(x_img, params, cfg, ops):
    p = cfg["patch_size"]
    D = cfg["embed_dim"]

    xp = image_to_patch(x_img, p)                 # (B, N, C*p*p)
    B, N, patch_dim = xp.shape

    tok = ops["linear"](xp.reshape(B * N, patch_dim),
                        params["in_w"], params["in_b"]).reshape(B, N, D)

    cls = jnp.broadcast_to(params["cls_token"], (B, 1, D))
    x = jnp.concatenate([cls, tok], axis=1)       # (B, N+1, D)
    x = x + params["pos_emb"][:, : N + 1]
    # dropout(p=0.0) is the identity in eval mode.

    for lp in params["layers"]:
        x = transformer_block(x, lp, cfg, ops)

    cls_out = x[:, 0]                             # (B, D)
    # Head: LayerNorm fused into the classifier matmul; output zero-padded to a
    # lane-dense 128 columns (no masked partial stores) and sliced back here.
    logits = ops["linear"](cls_out, params["head_w_pad"], params["head_b_pad"],
                           ln=(params["head_ln_g"], params["head_ln_b"]))
    return logits[:, : cfg["num_classes"]]


# ------------------------------ Parameter init ------------------------------ #

def _linear_init(key, fan_in, fan_out):
    kw, kb = jax.random.split(key)
    bound = 1.0 / math.sqrt(fan_in)
    w = jax.random.uniform(kw, (fan_in, fan_out), jnp.float32, -bound, bound)
    b = jax.random.uniform(kb, (fan_out,), jnp.float32, -bound, bound)
    return w, b


def init_params(key, cfg):
    D, H = cfg["embed_dim"], cfg["hidden_dim"]
    C, p = cfg["num_channels"], cfg["patch_size"]
    patch_dim = C * p * p

    keys = jax.random.split(key, 6 + cfg["num_layers"])
    params = {}
    params["in_w"], params["in_b"] = _linear_init(keys[0], patch_dim, D)
    params["cls_token"] = jax.random.uniform(keys[1], (1, 1, D), jnp.float32)
    params["pos_emb"] = jax.random.uniform(
        keys[2], (1, 1 + cfg["num_patches"], D), jnp.float32)
    params["head_ln_g"] = jnp.ones((D,), jnp.float32)
    params["head_ln_b"] = jnp.zeros((D,), jnp.float32)

    ncls = cfg["num_classes"]
    n_pad = ((ncls + 127) // 128) * 128           # lane-dense classifier output
    hw, hb = _linear_init(keys[3], D, ncls)
    params["head_w_pad"] = jnp.zeros((D, n_pad), jnp.float32).at[:, :ncls].set(hw)
    params["head_b_pad"] = jnp.zeros((n_pad,), jnp.float32).at[:ncls].set(hb)

    layers = []
    for li in range(cfg["num_layers"]):
        lk = jax.random.split(keys[6 + li], 4)
        lp = {}
        lp["ln1_g"] = jnp.ones((D,), jnp.float32)
        lp["ln1_b"] = jnp.zeros((D,), jnp.float32)
        lp["attn_in_w"], lp["attn_in_b"] = _linear_init(lk[0], D, 3 * D)
        lp["attn_out_w"], lp["attn_out_b"] = _linear_init(lk[1], D, D)
        lp["ln2_g"] = jnp.ones((D,), jnp.float32)
        lp["ln2_b"] = jnp.zeros((D,), jnp.float32)
        lp["mlp_w1"], lp["mlp_b1"] = _linear_init(lk[2], D, H)
        lp["mlp_w2"], lp["mlp_b2"] = _linear_init(lk[3], H, D)
        layers.append(lp)
    params["layers"] = layers
    return params


# ----------------------------------- Main ----------------------------------- #

if __name__ == "__main__":
    cfg = dict(
        embed_dim=128,     # lane-friendly (multiple of 128) but still small
        hidden_dim=256,
        num_channels=3,
        num_heads=4,
        num_layers=2,
        num_classes=10,
        patch_size=4,
        num_patches=16,    # (16/4) * (16/4)
    )

    key = jax.random.PRNGKey(0)
    kp, kx = jax.random.split(key)
    params = init_params(kp, cfg)
    x = jax.random.normal(kx, (2, cfg["num_channels"], 16, 16), jnp.float32)

    out = vit_forward(x, params, cfg, make_pallas_ops())
    out = jax.block_until_ready(out)
    assert out.shape == (2, cfg["num_classes"])

    ref = vit_forward(x, params, cfg, make_ref_ops())
    # Tolerance covers the EUP approximate reciprocal in the softmax
    # denominator and the in-kernel polynomial erf (|err| < 1.5e-7).
    if not jnp.allclose(out, ref, atol=2e-2, rtol=2e-2):
        raise AssertionError("Pallas ViT output mismatch vs JAX reference")

    print("KERNEL_OK")
</pallas_src>

<mosaic_0001>
module attributes {stable_mosaic.version = 11 : i64} {
  func.func @_linear_kernel(%arg0: i32, %arg1: i32, %arg2: i32, %arg3: memref<32x48xf32, #tpu.memory_space<vmem>>, %arg4: memref<48x128xf32, #tpu.memory_space<vmem>>, %arg5: memref<1x128xf32, #tpu.memory_space<vmem>>, %arg6: memref<32x128xf32, #tpu.memory_space<vmem>>, %arg7: memref<32x128xf32, #tpu.memory_space<vmem>>) attributes {dimension_semantics = [#tpu.dimension_semantics<parallel>, #tpu.dimension_semantics<parallel>, #tpu.dimension_semantics<arbitrary>], iteration_bounds = array<i64: 1, 1, 1>, scalar_prefetch = 0 : i64, scratch_operands = 1 : i64, tpu.core_type = #tpu.core_type<tc>, window_params = [{transform_indices = @transform_0, window_bounds = array<i64: 32, 48>}, {transform_indices = @transform_1, window_bounds = array<i64: 48, 128>}, {transform_indices = @transform_2, window_bounds = array<i64: 1, 128>}, {transform_indices = @transform_3, window_bounds = array<i64: 32, 128>}]} {
    %c0 = arith.constant 0 : index
    %c0_0 = arith.constant 0 : index
    %0 = vector.load %arg3[%c0, %c0_0] : memref<32x48xf32, #tpu.memory_space<vmem>>, vector<32x48xf32>
    %c0_1 = arith.constant 0 : index
    %c0_2 = arith.constant 0 : index
    %1 = vector.load %arg4[%c0_1, %c0_2] : memref<48x128xf32, #tpu.memory_space<vmem>>, vector<48x128xf32>
    %cst = arith.constant dense<0.000000e+00> : vector<32x128xf32>
    %2 = tpu.matmul %0, %1, %cst {dimension_numbers = #tpu.dot_dimension_numbers<[1], [0], [0], [1], [0, 0, 1, 1], [], []>} : vector<32x48xf32>, vector<48x128xf32>, vector<32x128xf32> -> vector<32x128xf32>
    %c0_i32 = arith.constant 0 : i32
    %3 = arith.cmpi eq, %arg2, %c0_i32 : i32
    %4 = arith.extui %3 : i1 to i32
    %c0_i32_3 = arith.constant 0 : i32
    %5 = arith.cmpi ne, %4, %c0_i32_3 : i32
    scf.if %5 {
      %c0_8 = arith.constant 0 : index
      %c0_9 = arith.constant 0 : index
      %12 = vector.load %arg7[%c0_8, %c0_9] : memref<32x128xf32, #tpu.memory_space<vmem>>, vector<32x128xf32>
      tpu.vector_store %arg7[%c0_8, %c0_9], %2 {strides = array<i32>} : memref<32x128xf32, #tpu.memory_space<vmem>>, vector<32x128xf32>,
    } else {
    }
    %c0_i32_4 = arith.constant 0 : i32
    %6 = arith.cmpi sgt, %arg2, %c0_i32_4 : i32
    %7 = arith.extui %6 : i1 to i32
    %c0_i32_5 = arith.constant 0 : i32
    %8 = arith.cmpi ne, %7, %c0_i32_5 : i32
    scf.if %8 {
      %c0_8 = arith.constant 0 : index
      %c0_9 = arith.constant 0 : index
      %12 = vector.load %arg7[%c0_8, %c0_9] : memref<32x128xf32, #tpu.memory_space<vmem>>, vector<32x128xf32>
      %13 = arith.addf %12, %2 : vector<32x128xf32>
      %c0_10 = arith.constant 0 : index
      %c0_11 = arith.constant 0 : index
      %14 = vector.load %arg7[%c0_10, %c0_11] : memref<32x128xf32, #tpu.memory_space<vmem>>, vector<32x128xf32>
      tpu.vector_store %arg7[%c0_10, %c0_11], %13 {strides = array<i32>} : memref<32x128xf32, #tpu.memory_space<vmem>>, vector<32x128xf32>,
    } else {
    }
    %c0_i32_6 = arith.constant 0 : i32
    %9 = arith.cmpi eq, %arg2, %c0_i32_6 : i32
    %10 = arith.extui %9 : i1 to i32
    %c0_i32_7 = arith.constant 0 : i32
    %11 = arith.cmpi ne, %10, %c0_i32_7 : i32
    scf.if %11 {
      %c0_8 = arith.constant 0 : index
      %c0_9 = arith.constant 0 : index
      %12 = vector.load %arg7[%c0_8, %c0_9] : memref<32x128xf32, #tpu.memory_space<vmem>>, vector<32x128xf32>
      %c0_10 = arith.constant 0 : index
      %c0_11 = arith.constant 0 : index
      %13 = vector.load %arg5[%c0_10, %c0_11] : memref<1x128xf32, #tpu.memory_space<vmem>>, vector<1x128xf32>
      %14 = vector.broadcast %13 : vector<1x128xf32> to vector<32x128xf32>
      %15 = arith.addf %12, %14 : vector<32x128xf32>
      %c0_12 = arith.constant 0 : index
      %c0_13 = arith.constant 0 : index
      %16 = vector.load %arg6[%c0_12, %c0_13] : memref<32x128xf32, #tpu.memory_space<vmem>>, vector<32x128xf32>
      tpu.vector_store %arg6[%c0_12, %c0_13], %15 {strides = array<i32>} : memref<32x128xf32, #tpu.memory_space<vmem>>, vector<32x128xf32>,
    } else {
    }
    return
  }
  func.func @transform_0(%arg0: i32, %arg1: i32, %arg2: i32) -> (i32, i32) {
    %c0_i32 = arith.constant 0 : i32
    return %arg0, %arg2 : i32, i32
  }
  func.func @transform_1(%arg0: i32, %arg1: i32, %arg2: i32) -> (i32, i32) {
    %c0_i32 = arith.constant 0 : i32
    return %arg2, %arg1 : i32, i32
  }
  func.func @transform_2(%arg0: i32, %arg1: i32, %arg2: i32) -> (i32, i32) {
    %c0_i32 = arith.constant 0 : i32
    %c0_i32_0 = arith.constant 0 : i32
    return %c0_i32, %arg1 : i32, i32
  }
  func.func @transform_3(%arg0: i32, %arg1: i32, %arg2: i32) -> (i32, i32) {
    %c0_i32 = arith.constant 0 : i32
    return %arg0, %arg1 : i32, i32
  }
}

</mosaic_0001>

<bundles_post_ra>
// kernel: tpu_custom_call.1
= control target key start
LH: loop header
LB: loop body
LE: loop exit
PB: predicated region body
PF: predicated region fallthrough
CT: control target
= control target key end

     0   :  { %8 = vsyncpa [#allocation4], 0  ;;  %s420_s0 = inlined_call_operand.hbm [shape: f32[32,48], index: 0, kind: input, shape index: {}]   ;;  %s421_s1 = inlined_call_operand.hbm [shape: f32[48,128], index: 1, kind: input, shape index: {}]   ;;  %s422_s2 = inlined_call_operand.vmem [shape: f32[1,128], index: 2, kind: input, shape index: {}]   ;;  %s423_s3 = inlined_call_operand.hbm [shape: f32[32,128], index: 3, kind: output, shape index: {}]  }
   0x1   :  { %9 = vsyncpa [#allocation7], 0 }
   0x2   :  { %10 = vsyncpa [#allocation5], 0  ;;  %s343_s12 = smov [#allocation3]   ;;  %s271_s16 = scalar_lea.hbm %s420_s0, 512 }
   0x3   :  { %s16_s13 = sshll.u32 %s343_s12, 4  ;;  %p272_p0 = scmp.ne.s32.totalorder %s420_s0, %s271_s16  ;;  %s17_s13 = int_to_ptr.vmem [resolvable:$true] %s16_s13 }
   0x4   :  { %p275_p1 = scmp.lt.u32.totalorder %s271_s16, %s420_s0 }
   0x6   :  { %p277_p2 = pnand %p275_p1, %p272_p0 }
   0x8   :  { %280 = shalt.err (!%p277_p2)
}
   0x9   :  { %s281_s21 = scalar_lea.vmem %s17_s13, 512  ;;  %p286_p4 = scmp.lt.s32.totalorder %s17_s13, %s17_s13 }
   0xa   :  { %p282_p3 = scmp.ne.s32.totalorder %s17_s13, %s281_s21  ;;  %p287_p5 = scmp.lt.s32.totalorder %s281_s21, %s281_s21 }
   0xc   :  { %p288_p6 = por %p287_p5, %p286_p4 }
   0xe   :  { %p289_p7 = pnand %p288_p6, %p282_p3 }
  0x10   :  { %292 = shalt.err (!%p289_p7)
}
  0x11   :  { %s344_s22 = smov 128   ;;  %s345_s23 = smov 8  }
  0x12   :  { %22 = dma.hbm_to_vmem [thread:$0]  %s420_s0, 512, %s17_s13, [#allocation4], %s344_s22, %s344_s22, %s345_s23  }
  0x13   :  { %s346_s26 = smov [#allocation6]   ;;  %s293_s30 = scalar_lea.hbm %s421_s1, 768 }
  0x14   :  { %s28_s27 = sshll.u32 %s346_s26, 4  ;;  %p294_p8 = scmp.ne.s32.totalorder %s421_s1, %s293_s30  ;;  %s29_s27 = int_to_ptr.vmem [resolvable:$true] %s28_s27 }
  0x15   :  { %p297_p9 = scmp.lt.u32.totalorder %s293_s30, %s421_s1 }
  0x17   :  { %p299_p10 = pnand %p297_p9, %p294_p8 }
  0x19   :  { %302 = shalt.err (!%p299_p10)
}
  0x1a   :  { %s303_s8 = scalar_lea.vmem %s29_s27, 768  ;;  %p308_p12 = scmp.lt.s32.totalorder %s29_s27, %s29_s27 }
  0x1b   :  { %p304_p11 = scmp.ne.s32.totalorder %s29_s27, %s303_s8  ;;  %p309_p13 = scmp.lt.s32.totalorder %s303_s8, %s303_s8 }
  0x1d   :  { %p310_p0 = por %p309_p13, %p308_p12 }
  0x1f   :  { %p311_p1 = pnand %p310_p0, %p304_p11 }
  0x21   :  { %314 = shalt.err (!%p311_p1)
}
  0x22   :  { %34 = dma.hbm_to_vmem [thread:$0]  %s421_s1, 768, %s29_s27, [#allocation7], %s344_s22, %s344_s22, %s345_s23  }
  0x23   :  { %337 = dma.done.wait [#allocation4], 512  }
  0x24   :  { %338 = vsyncadd [#allocation4], 4294966784 }
  0x25   :  { %339 = dma.done.wait [#allocation7], 768  }
  0x26   :  { %340 = vsyncadd [#allocation7], 4294966528  ;;  %v47_v0 = vld [vmem:[#allocation6] sm:$0xff]  ;;  %v48_v1 = vld [vmem:[#allocation6 + $0x8] sm:$0xff]  ;;  %vm53_vm0 = vcmask 392192   ;;  %s347_s11 = smov [#allocation8]  }
  0x27   :  { %v49_v2 = vld [vmem:[#allocation6 + $0x10] sm:$0xff]  ;;  %v248_v3 = vpack.c.bf16 %v48_v1, %v47_v0  ;;  %v50_v4 = vld [vmem:[#allocation6 + $0x18] sm:$0xff]  ;;  %v51_v6 = vld [vmem:[#allocation6 + $0x20] sm:$0xff]  ;;  %s202_s12 = sshll.u32 %s347_s11, 4  ;;  %s203_s12 = int_to_ptr.vmem [resolvable:$true] %s202_s12 }
  0x28   :  { %v252_v5 = vpack.c.bf16 %v50_v4, %v49_v2  ;;  %v52_v7 = vld [vmem:[#allocation6 + $0x28] sm:$0xff]  ;;  %v43_v8 = vld [vmem:[#allocation3] sm:$0xff]  ;;  %v45_v9 = vld [vmem:[#allocation3 + $0x10] sm:$0xff]  ;;  %s315_s13 = scalar_lea.vmem %s203_s12, 512  ;;  %p320_p3 = scmp.lt.s32.totalorder %s203_s12, %s203_s12 }
  0x29   :  { %249 = vmatprep.subr.bf16.mxu0 %v248_v3  ;;  %260 = vmatprep.subr.bf16.mxu1 %v248_v3  ;;  %v256_v10 = vpack.c.bf16 %v52_v7, %v51_v6  ;;  %v44_v11 = vld [vmem:[#allocation3 + $0x8] sm:$0xff]  ;;  %v46_v12 = vld [vmem:[#allocation3 + $0x18] sm:$0xff]  ;;  %v219_v13 = vld [vmem:[%s422_s2] ss:$0 sm:$0xff]  ;;  %p316_p2 = scmp.ne.s32.totalorder %s203_s12, %s315_s13  ;;  %p321_p4 = scmp.lt.s32.totalorder %s315_s13, %s315_s13 }
  0x2a   :  { %251 = vmatpush3.bf16.msra.mxu0 %v248_v3  ;;  %263 = vmatpush3.bf16.msra.mxu1 %v248_v3 }
  0x2b   :  { %253 = vmatprep.subr.bf16.mxu0 %v252_v5  ;;  %261 = vmatprep.subr.bf16.mxu1 %v252_v5  ;;  %p322_p5 = por %p321_p4, %p320_p3 }
  0x2c   :  { %242 = vmatprep.mubr.msk.f32.mxu0 %vm53_vm0, %v43_v8  ;;  %245 = vmatprep.mubr.msk.f32.mxu1 %vm53_vm0, %v45_v9 }
  0x2d   :  { %p323_p6 = pnand %p322_p5, %p316_p2 }
  0x2e   :  { %255 = vmatpush3.bf16.msra.mxu0 %v252_v5  ;;  %264 = vmatpush3.bf16.msra.mxu1 %v252_v5 }
  0x2f   :  { %257 = vmatprep.subr.bf16.mxu0 %v256_v10  ;;  %262 = vmatprep.subr.bf16.mxu1 %v256_v10 }
  0x32   :  { %259 = vmatpush3.bf16.msra.mxu0 %v256_v10  ;;  %265 = vmatpush3.bf16.msra.mxu1 %v256_v10 }
  0x35   :  { %243 = vmatmul.mubr.msk.f32.vlgmr.msra.gmra.mrb[0].mxu0 %vm53_vm0, %v44_v11  ;;  %246 = vmatmul.mubr.msk.f32.vlgmr.msra.gmra.mrb[0].mxu1 %vm53_vm0, %v46_v12 }
 0x108   :  { %v244_v14 = vpop.f32.mrb[0].mxu0  ;;  %v247_v15 = vpop.f32.mrb[0].mxu1 }
 0x109   :  { %v190_v16 = vadd.f32 %v244_v14, %v219_v13  ;;  %v192_v17 = vadd.f32 %v247_v15, %v219_v13  ;;  %v132_v18 = vpop.f32.mrb[1].mxu0  ;;  %v142_v19 = vpop.f32.mrb[1].mxu1 }
 0x10a   :  { %v189_v20 = vadd.f32 %v219_v13, %v132_v18  ;;  %v191_v21 = vadd.f32 %v219_v13, %v142_v19 }
 0x10b   :  { %194 = vst [vmem:[#allocation8 + $0x8] sm:$0xff] %v190_v16  ;;  %196 = vst [vmem:[#allocation8 + $0x18] sm:$0xff] %v192_v17 }
 0x10c   :  { %193 = vst [vmem:[#allocation8] sm:$0xff] %v189_v20  ;;  %195 = vst [vmem:[#allocation8 + $0x10] sm:$0xff] %v191_v21 }
 0x10d   :  { %326 = shalt.err (!%p323_p6)
}
 0x10e   :  { %s327_s15 = scalar_lea.hbm %s423_s3, 512 }
 0x10f   :  { %p328_p7 = scmp.ne.s32.totalorder %s423_s3, %s327_s15  ;;  %p331_p8 = scmp.lt.u32.totalorder %s327_s15, %s423_s3 }
 0x111   :  { %p333_p9 = pnand %p331_p8, %p328_p7 }
 0x113   :  { %336 = shalt.err (!%p333_p9)
}
 0x114   :  { %208 = dma.vmem_to_hbm [thread:$0]  %s203_s12, 512, %s423_s3, [#allocation5], %s344_s22, %s344_s22, %s345_s23  }
 0x115   :  { %341 = dma.done.wait [#allocation5], 512  }
 0x116   :  { %342 = vsyncadd [#allocation5], 4294966784 }
 0x117   :  { %212 = vsyncpa [#allocation4], 1 }
 0x118   :  { %213 = vsyncpa [#allocation7], 1 }
 0x119   :  { %214 = vsyncpa [#allocation5], 1 }

</bundles_post_ra>
